<compile_context>
chip_gen: v6e
topology: v6e:2x2x1
jax: 0.10.0
libtpu: 0.0.40
codegen_flags: <defaults>
</compile_context>

<pallas_src>
import math

import jax
import jax.numpy as jnp
from jax import lax
from jax.experimental import pallas as pl
from jax.experimental.pallas import tpu as pltpu

N_IN = 41
N_HIDDEN = 20
N_OUT = 41

LANE = 128
DEFAULT_MAX_BATCH_TILE = 16384   # rows per grid step (HBM<->VMEM DMA block)
DEFAULT_CHUNK = 2048             # rows per in-kernel compute sub-tile


def _round_up(n, m):
    return ((n + m - 1) // m) * m


def _choose_tiling(batch, max_batch_tile):
    """Pad only to 128 rows; pick a tile that gives >= 2 grid steps whenever possible."""
    b128 = _round_up(max(batch, 1), LANE)
    min_steps = 2 if b128 >= 2 * LANE else 1          # pipeline overlap + v7x 2nd TensorCore
    n_steps = max(pl.cdiv(b128, max_batch_tile), min_steps)
    batch_tile = _round_up(pl.cdiv(b128, n_steps), LANE)
    n_steps = max(pl.cdiv(b128, batch_tile), min_steps)
    return batch_tile, n_steps, n_steps * batch_tile


def _make_kernel(chunk, n_full, rem, mxu_dtype):
    """Kernel over one (batch_tile, 41) block; batch_tile == n_full*chunk + rem."""

    def kernel(x_ref, w1_ref, b1_ref, w2_ref, b2_ref, w3_ref, b3_ref, o_ref):
        def run_chunk(start, size):
            xb = x_ref[pl.ds(start, size), :].astype(mxu_dtype)              # (size, 41)
            # fc1 + relu  (MXU bf16 x bf16 -> f32 accumulate; elementwise in f32)
            h = jnp.dot(xb, w1_ref[...], preferred_element_type=jnp.float32)  # (size, 20)
            h = jnp.maximum(h + b1_ref[...], 0.0)
            # fc2 + relu
            h = jnp.dot(h.astype(mxu_dtype), w2_ref[...],
                        preferred_element_type=jnp.float32)                   # (size, 20)
            h = jnp.maximum(h + b2_ref[...], 0.0)
            # fc3 (no activation) -> natural batch-major output, stored in out dtype (bf16)
            out = jnp.dot(h.astype(mxu_dtype), w3_ref[...],
                          preferred_element_type=jnp.float32)                 # (size, 41)
            o_ref[pl.ds(start, size), :] = (out + b3_ref[...]).astype(o_ref.dtype)

        if n_full > 0:
            def loop_body(c, carry):
                run_chunk(pl.multiple_of(c * chunk, chunk), chunk)
                return carry
            lax.fori_loop(0, n_full, loop_body, None)
        if rem > 0:
            run_chunk(n_full * chunk, rem)

    return kernel


def wavefc_forward(x, params, *, out_dtype=jnp.bfloat16, mxu_dtype=jnp.bfloat16,
                   max_batch_tile=DEFAULT_MAX_BATCH_TILE, chunk=DEFAULT_CHUNK):
    """x: (B, 41). params: PyTorch-layout weights w* (out, in) and biases b* (out,).

    Returns (B, 41) in `out_dtype` (bf16 by default; pass jnp.float32 for the original
    dtype at the cost of 2x output HBM traffic)."""
    B, F = x.shape
    assert F == N_IN

    batch_tile, n_steps, B_pad = _choose_tiling(B, max_batch_tile)
    chunk = max(LANE, min(_round_up(chunk, LANE), batch_tile))
    n_full, rem = divmod(batch_tile, chunk)

    # Only padding (when needed) remains on the wrapper side; no transpose/cast pass.
    x_in = x if B_pad == B else jnp.pad(x, ((0, B_pad - B), (0, 0)))

    # One-time tiny weight preparation: transpose to (in, out) so all kernel matmuls are
    # standard contractions, cast weights to bf16 for the MXU, keep biases in f32 (VPU).
    w1 = jnp.asarray(params["w1"]).T.astype(mxu_dtype)                 # (41, 20)
    w2 = jnp.asarray(params["w2"]).T.astype(mxu_dtype)                 # (20, 20)
    w3 = jnp.asarray(params["w3"]).T.astype(mxu_dtype)                 # (20, 41)
    b1 = jnp.asarray(params["b1"]).reshape(1, N_HIDDEN).astype(jnp.float32)
    b2 = jnp.asarray(params["b2"]).reshape(1, N_HIDDEN).astype(jnp.float32)
    b3 = jnp.asarray(params["b3"]).reshape(1, N_OUT).astype(jnp.float32)

    def resident(arr):
        # Full block, constant index_map -> stays VMEM-resident across all grid steps.
        return pl.BlockSpec(arr.shape, lambda i: (0, 0))

    # VMEM budget: double-buffered I/O blocks (41-wide last dim pads to one 128-lane tile)
    # plus chunk-bounded f32/bf16 intermediates.  Derived limit stays < v7x's 64 MiB physical.
    in_isz = jnp.dtype(x_in.dtype).itemsize
    out_isz = jnp.dtype(out_dtype).itemsize
    vmem_est = (2 * batch_tile * LANE * in_isz          # double-buffered input block
                + 2 * batch_tile * LANE * out_isz       # double-buffered output block
                + chunk * LANE * 20                     # per-chunk intermediates
                + (1 << 20))                            # weights/biases + slack
    vmem_limit = max(32 * 1024 * 1024, (vmem_est * 3) // 2)

    kernel = _make_kernel(chunk, n_full, rem, mxu_dtype)

    out = pl.pallas_call(
        kernel,
        out_shape=jax.ShapeDtypeStruct((B_pad, N_OUT), out_dtype),
        grid_spec=pltpu.PrefetchScalarGridSpec(
            num_scalar_prefetch=0,
            grid=(n_steps,),
            in_specs=[
                pl.BlockSpec((batch_tile, N_IN), lambda i: (i, 0)),   # batch-tiled input
                resident(w1), resident(b1),
                resident(w2), resident(b2),
                resident(w3), resident(b3),
            ],
            out_specs=pl.BlockSpec((batch_tile, N_OUT), lambda i: (i, 0)),
        ),
        compiler_params=pltpu.CompilerParams(
            dimension_semantics=("parallel",),
            vmem_limit_bytes=int(vmem_limit),
        ),
    )(x_in, w1, b1, w2, b2, w3, b3)

    return out[:B]


def init_params(key):
    """Deterministic init mimicking PyTorch nn.Linear default (uniform +/- 1/sqrt(fan_in)).
    Weights stored in PyTorch orientation (out_features, in_features)."""
    def linear(k, fan_in, fan_out):
        kw, kb = jax.random.split(k)
        bound = 1.0 / math.sqrt(fan_in)
        w = jax.random.uniform(kw, (fan_out, fan_in), jnp.float32, -bound, bound)
        b = jax.random.uniform(kb, (fan_out,), jnp.float32, -bound, bound)
        return w, b

    k1, k2, k3 = jax.random.split(key, 3)
    w1, b1 = linear(k1, N_IN, N_HIDDEN)
    w2, b2 = linear(k2, N_HIDDEN, N_HIDDEN)
    w3, b3 = linear(k3, N_HIDDEN, N_OUT)
    return {"w1": w1, "b1": b1, "w2": w2, "b2": b2, "w3": w3, "b3": b3}


def wavefc_reference_f32(x, params):
    """Pure f32 reference matching the PyTorch module exactly."""
    h = jnp.maximum(x @ params["w1"].T + params["b1"], 0.0)
    h = jnp.maximum(h @ params["w2"].T + params["b2"], 0.0)
    return h @ params["w3"].T + params["b3"]


def wavefc_reference_bf16(x, params, out_dtype=jnp.bfloat16):
    """Reference mirroring the kernel's bf16-input / f32-accumulate / bf16-output arithmetic."""
    dt = jnp.bfloat16
    w1, w2, w3 = (params[k].astype(dt) for k in ("w1", "w2", "w3"))
    h = jnp.dot(x.astype(dt), w1.T, preferred_element_type=jnp.float32) + params["b1"]
    h = jnp.maximum(h, 0.0)
    h = jnp.dot(h.astype(dt), w2.T, preferred_element_type=jnp.float32) + params["b2"]
    h = jnp.maximum(h, 0.0)
    out = jnp.dot(h.astype(dt), w3.T, preferred_element_type=jnp.float32) + params["b3"]
    return out.astype(out_dtype)


if __name__ == "__main__":
    key = jax.random.PRNGKey(0)
    kp, kx1, kx2 = jax.random.split(key, 3)
    params = init_params(kp)

    def check(x, **kw):
        out = jax.block_until_ready(wavefc_forward(x, params, **kw))
        assert out.shape == (x.shape[0], N_OUT)
        out32 = out.astype(jnp.float32)
        ref_b = wavefc_reference_bf16(x, params).astype(jnp.float32)
        ref_f = wavefc_reference_f32(x, params)
        assert jnp.allclose(out32, ref_b, atol=1e-2, rtol=1e-2), float(
            jnp.max(jnp.abs(out32 - ref_b)))
        assert jnp.allclose(out32, ref_f, atol=1e-1, rtol=1e-1), float(
            jnp.max(jnp.abs(out32 - ref_f)))

    # Small primary case (single grid step, single compute chunk).
    x1 = jax.random.normal(kx1, (8, N_IN), jnp.float32)
    check(x1)

    # Exercise the multi-step grid, the multi-chunk inner loop, and the remainder chunk.
    x2 = jax.random.normal(kx2, (700, N_IN), jnp.float32)
    check(x2, chunk=128)   # 2 grid steps x 3 full 128-row chunks
    check(x2, chunk=256)   # 2 grid steps x (1 full 256-row chunk + 128-row remainder)

    print("KERNEL_OK")
</pallas_src>

<mosaic_0001>
module attributes {stable_mosaic.version = 11 : i64} {
  func.func @kernel(%arg0: i32, %arg1: memref<128x41xf32, #tpu.memory_space<vmem>>, %arg2: memref<41x20xbf16, #tpu.memory_space<vmem>>, %arg3: memref<1x20xf32, #tpu.memory_space<vmem>>, %arg4: memref<20x20xbf16, #tpu.memory_space<vmem>>, %arg5: memref<1x20xf32, #tpu.memory_space<vmem>>, %arg6: memref<20x41xbf16, #tpu.memory_space<vmem>>, %arg7: memref<1x41xf32, #tpu.memory_space<vmem>>, %arg8: memref<128x41xbf16, #tpu.memory_space<vmem>>) attributes {dimension_semantics = [#tpu.dimension_semantics<parallel>], iteration_bounds = array<i64: 1>, scalar_prefetch = 0 : i64, scratch_operands = 0 : i64, tpu.core_type = #tpu.core_type<tc>, window_params = [{transform_indices = @transform_0, window_bounds = array<i64: 128, 41>}, {pipeline_mode = #tpu.pipeline_mode<synchronous>, transform_indices = @transform_1, window_bounds = array<i64: 41, 20>}, {pipeline_mode = #tpu.pipeline_mode<synchronous>, transform_indices = @transform_2, window_bounds = array<i64: 1, 20>}, {pipeline_mode = #tpu.pipeline_mode<synchronous>, transform_indices = @transform_3, window_bounds = array<i64: 20, 20>}, {pipeline_mode = #tpu.pipeline_mode<synchronous>, transform_indices = @transform_4, window_bounds = array<i64: 1, 20>}, {pipeline_mode = #tpu.pipeline_mode<synchronous>, transform_indices = @transform_5, window_bounds = array<i64: 20, 41>}, {pipeline_mode = #tpu.pipeline_mode<synchronous>, transform_indices = @transform_6, window_bounds = array<i64: 1, 41>}, {transform_indices = @transform_7, window_bounds = array<i64: 128, 41>}]} {
    %c0_i32 = arith.constant 0 : i32
    %c128_i32 = arith.constant 128 : i32
    %0 = arith.muli %c0_i32, %c128_i32 : i32
    %1 = tpu.assume_multiple %0, 128 : i32
    %2 = arith.index_cast %1 : i32 to index
    %c0 = arith.constant 0 : index
    %3 = vector.load %arg1[%2, %c0] : memref<128x41xf32, #tpu.memory_space<vmem>>, vector<128x41xf32>
    %4 = arith.truncf %3 : vector<128x41xf32> to vector<128x41xbf16>
    %c0_0 = arith.constant 0 : index
    %c0_1 = arith.constant 0 : index
    %5 = vector.load %arg2[%c0_0, %c0_1] : memref<41x20xbf16, #tpu.memory_space<vmem>>, vector<41x20xbf16>
    %cst = arith.constant dense<0.000000e+00> : vector<128x20xf32>
    %6 = tpu.matmul %4, %5, %cst {dimension_numbers = #tpu.dot_dimension_numbers<[1], [0], [0], [1], [0, 0, 1, 1], [], []>} : vector<128x41xbf16>, vector<41x20xbf16>, vector<128x20xf32> -> vector<128x20xf32>
    %c0_2 = arith.constant 0 : index
    %c0_3 = arith.constant 0 : index
    %7 = vector.load %arg3[%c0_2, %c0_3] : memref<1x20xf32, #tpu.memory_space<vmem>>, vector<1x20xf32>
    %8 = vector.broadcast %7 : vector<1x20xf32> to vector<128x20xf32>
    %9 = arith.addf %6, %8 : vector<128x20xf32>
    %cst_4 = arith.constant 0.000000e+00 : f32
    %10 = vector.broadcast %cst_4 : f32 to vector<128x20xf32>
    %11 = arith.maximumf %9, %10 : vector<128x20xf32>
    %12 = arith.truncf %11 : vector<128x20xf32> to vector<128x20xbf16>
    %c0_5 = arith.constant 0 : index
    %c0_6 = arith.constant 0 : index
    %13 = vector.load %arg4[%c0_5, %c0_6] : memref<20x20xbf16, #tpu.memory_space<vmem>>, vector<20x20xbf16>
    %cst_7 = arith.constant dense<0.000000e+00> : vector<128x20xf32>
    %14 = tpu.matmul %12, %13, %cst_7 {dimension_numbers = #tpu.dot_dimension_numbers<[1], [0], [0], [1], [0, 0, 1, 1], [], []>} : vector<128x20xbf16>, vector<20x20xbf16>, vector<128x20xf32> -> vector<128x20xf32>
    %c0_8 = arith.constant 0 : index
    %c0_9 = arith.constant 0 : index
    %15 = vector.load %arg5[%c0_8, %c0_9] : memref<1x20xf32, #tpu.memory_space<vmem>>, vector<1x20xf32>
    %16 = vector.broadcast %15 : vector<1x20xf32> to vector<128x20xf32>
    %17 = arith.addf %14, %16 : vector<128x20xf32>
    %cst_10 = arith.constant 0.000000e+00 : f32
    %18 = vector.broadcast %cst_10 : f32 to vector<128x20xf32>
    %19 = arith.maximumf %17, %18 : vector<128x20xf32>
    %20 = arith.truncf %19 : vector<128x20xf32> to vector<128x20xbf16>
    %c0_11 = arith.constant 0 : index
    %c0_12 = arith.constant 0 : index
    %21 = vector.load %arg6[%c0_11, %c0_12] : memref<20x41xbf16, #tpu.memory_space<vmem>>, vector<20x41xbf16>
    %cst_13 = arith.constant dense<0.000000e+00> : vector<128x41xf32>
    %22 = tpu.matmul %20, %21, %cst_13 {dimension_numbers = #tpu.dot_dimension_numbers<[1], [0], [0], [1], [0, 0, 1, 1], [], []>} : vector<128x20xbf16>, vector<20x41xbf16>, vector<128x41xf32> -> vector<128x41xf32>
    %c0_14 = arith.constant 0 : index
    %c0_15 = arith.constant 0 : index
    %23 = vector.load %arg7[%c0_14, %c0_15] : memref<1x41xf32, #tpu.memory_space<vmem>>, vector<1x41xf32>
    %24 = vector.broadcast %23 : vector<1x41xf32> to vector<128x41xf32>
    %25 = arith.addf %22, %24 : vector<128x41xf32>
    %26 = arith.truncf %25 : vector<128x41xf32> to vector<128x41xbf16>
    %27 = arith.index_cast %1 : i32 to index
    %c0_16 = arith.constant 0 : index
    %28 = vector.load %arg8[%27, %c0_16] : memref<128x41xbf16, #tpu.memory_space<vmem>>, vector<128x41xbf16>
    tpu.vector_store %arg8[%27, %c0_16], %26 {strides = array<i32>} : memref<128x41xbf16, #tpu.memory_space<vmem>>, vector<128x41xbf16>,
    %c1_i32 = arith.constant 1 : i32
    return
  }
  func.func @transform_0(%arg0: i32) -> (i32, i32) {
    %c0_i32 = arith.constant 0 : i32
    %c0_i32_0 = arith.constant 0 : i32
    return %arg0, %c0_i32 : i32, i32
  }
  func.func @transform_1(%arg0: i32) -> (i32, i32) {
    %c0_i32 = arith.constant 0 : i32
    %c0_i32_0 = arith.constant 0 : i32
    %c0_i32_1 = arith.constant 0 : i32
    return %c0_i32, %c0_i32_0 : i32, i32
  }
  func.func @transform_2(%arg0: i32) -> (i32, i32) {
    %c0_i32 = arith.constant 0 : i32
    %c0_i32_0 = arith.constant 0 : i32
    %c0_i32_1 = arith.constant 0 : i32
    return %c0_i32, %c0_i32_0 : i32, i32
  }
  func.func @transform_3(%arg0: i32) -> (i32, i32) {
    %c0_i32 = arith.constant 0 : i32
    %c0_i32_0 = arith.constant 0 : i32
    %c0_i32_1 = arith.constant 0 : i32
    return %c0_i32, %c0_i32_0 : i32, i32
  }
  func.func @transform_4(%arg0: i32) -> (i32, i32) {
    %c0_i32 = arith.constant 0 : i32
    %c0_i32_0 = arith.constant 0 : i32
    %c0_i32_1 = arith.constant 0 : i32
    return %c0_i32, %c0_i32_0 : i32, i32
  }
  func.func @transform_5(%arg0: i32) -> (i32, i32) {
    %c0_i32 = arith.constant 0 : i32
    %c0_i32_0 = arith.constant 0 : i32
    %c0_i32_1 = arith.constant 0 : i32
    return %c0_i32, %c0_i32_0 : i32, i32
  }
  func.func @transform_6(%arg0: i32) -> (i32, i32) {
    %c0_i32 = arith.constant 0 : i32
    %c0_i32_0 = arith.constant 0 : i32
    %c0_i32_1 = arith.constant 0 : i32
    return %c0_i32, %c0_i32_0 : i32, i32
  }
  func.func @transform_7(%arg0: i32) -> (i32, i32) {
    %c0_i32 = arith.constant 0 : i32
    %c0_i32_0 = arith.constant 0 : i32
    return %arg0, %c0_i32 : i32, i32
  }
}

</mosaic_0001>

<bundles_post_ra>
// kernel: tpu_custom_call.1
= control target key start
LH: loop header
LB: loop body
LE: loop exit
PB: predicated region body
PF: predicated region fallthrough
CT: control target
= control target key end

     0   :  { %vm106_vm0 = vcmask 1043456   ;;  %vm107_vm1 = vcmask 1044480   ;;  %v805_v1 = vmov 65535   ;;  %vm81_vm2 = vcmask 334848   ;;  %s1035_s1 = inlined_call_operand.vmem [shape: bf16[41,20], index: 1, kind: input, shape index: {}]   ;;  %s1036_s0 = inlined_call_operand.vmem [shape: f32[128,41], index: 0, kind: input, shape index: {}]   ;;  %s1037_s3 = inlined_call_operand.vmem [shape: bf16[20,20], index: 3, kind: input, shape index: {}]   ;;  %s1038_s5 = inlined_call_operand.vmem [shape: bf16[20,41], index: 5, kind: input, shape index: {}]   ;;  %s1039_s2 = inlined_call_operand.vmem [shape: f32[1,20], index: 2, kind: input, shape index: {}]   ;;  %s1040_s4 = inlined_call_operand.vmem [shape: f32[1,20], index: 4, kind: input, shape index: {}]   ;;  %s1041_s6 = inlined_call_operand.vmem [shape: f32[1,41], index: 6, kind: input, shape index: {}]   ;;  %s1042_s7 = inlined_call_operand.vmem [shape: bf16[128,41], index: 7, kind: output, shape index: {}]  }
   0x1   :  { %v798_v0 = vld [vmem:[%s1035_s1 + $0x10] sm:$0x1f]   ;;  %v108_v2 = vsel %vm106_vm0, 4294967295, %v805_v1  ;;  %v799_v5 = vld [vmem:[%s1035_s1 + $0x8] sm:$0xff]   ;;  %v27_v6 = vld [vmem:[%s1036_s0] sm:$0xff]  ;;  %vm278_vm3 = vcmask 1041408  }
   0x2   :  { %v109_v3 = vsel %vm107_vm1, %v108_v2, 0  ;;  %v28_v7 = vld [vmem:[%s1036_s0 + $0x8] sm:$0xff]  ;;  %v800_v9 = vld [vmem:[%s1035_s1] sm:$0xff]   ;;  %v29_v11 = vld [vmem:[%s1036_s0 + $0x10] sm:$0xff]  ;;  %vm253_vm4 = vcmask 162816   ;;  %vm610_vm5 = vcmask 330752  }
   0x3   :  { %v111_v4 = vand.u32 %v798_v0, %v109_v3  ;;  %v43_v8 = vpack.c.bf16 %v28_v7, %v27_v6  ;;  %v801_v10 = vld [vmem:[%s1037_s3 + $0x8] ss:$0 sps:$4 sm:$0x33]   ;;  %v30_v12 = vld [vmem:[%s1036_s0 + $0x18] sm:$0xff]  ;;  %v802_v14 = vld [vmem:[%s1037_s3] sm:$0xff]  }
   0x4   :  { %v280_v13 = vsel %vm278_vm3, %v801_v10, 0  ;;  %795 = vmatprep.subr.msk.bf16.mxu1 %vm278_vm3, %v801_v10  ;;  %v31_v15 = vld [vmem:[%s1036_s0 + $0x20] sm:$0xff]  ;;  %v32_v16 = vld [vmem:[%s1036_s0 + $0x28] sm:$0xff]  ;;  %v44_v17 = vpack.c.bf16 %v30_v12, %v29_v11  ;;  %v33_v19 = vld [vmem:[%s1036_s0 + $0x30] sm:$0xff] }
   0x5   :  { %728 = vmatprep.subr.bf16.mxu0 %v111_v4  ;;  %734 = vmatprep.mubr.msk.bf16.mxu0 %vm81_vm2, %v43_v8  ;;  %v45_v18 = vpack.c.bf16 %v32_v16, %v31_v15  ;;  %v34_v20 = vld [vmem:[%s1036_s0 + $0x38] sm:$0xff]  ;;  %v35_v21 = vld [vmem:[%s1036_s0 + $0x40] sm:$0xff]  ;;  %v36_v22 = vld [vmem:[%s1036_s0 + $0x48] sm:$0xff] }
   0x6   :  { %729 = vmatpush3.bf16.msra.mxu0 %v111_v4  ;;  %792 = vmatpush3.bf16.msra.mxu1 %v280_v13  ;;  %v46_v23 = vpack.c.bf16 %v34_v20, %v33_v19  ;;  %v47_v24 = vpack.c.bf16 %v36_v22, %v35_v21  ;;  %v37_v25 = vld [vmem:[%s1036_s0 + $0x50] sm:$0xff]  ;;  %v38_v26 = vld [vmem:[%s1036_s0 + $0x58] sm:$0xff]  ;;  %v39_v27 = vld [vmem:[%s1036_s0 + $0x60] sm:$0xff] }
   0x7   :  { %730 = vmatprep.subr.bf16.mxu0 %v799_v5  ;;  %791 = vmatprep.subr.bf16.mxu1 %v802_v14  ;;  %v40_v28 = vld [vmem:[%s1036_s0 + $0x68] sm:$0xff]  ;;  %v48_v29 = vpack.c.bf16 %v38_v26, %v37_v25  ;;  %v41_v31 = vld [vmem:[%s1036_s0 + $0x70] sm:$0xff]  ;;  %v42_v32 = vld [vmem:[%s1036_s0 + $0x78] sm:$0xff] }
   0x8   :  { %v49_v30 = vpack.c.bf16 %v40_v28, %v39_v27  ;;  %v50_v33 = vpack.c.bf16 %v42_v32, %v41_v31  ;;  %v803_v34 = vld [vmem:[%s1038_s5 + $0x8] ss:$0 sps:$4 sm:$0x33]   ;;  %v631_v37 = vld [vmem:[%s1039_s2] ss:$0 sm:$0xff] }
   0x9   :  { %v447_v3 = vsel %vm278_vm3, %v803_v34, 0  ;;  %v643_v32 = vld [vmem:[%s1040_s4] ss:$0 sm:$0xff] }
   0xa   :  { %731 = vmatpush3.bf16.msra.mxu0 %v799_v5  ;;  %793 = vmatpush3.bf16.msra.mxu1 %v802_v14 }
   0xb   :  { %732 = vmatprep.subr.bf16.mxu0 %v800_v9  ;;  %796 = vmatprep.subr.msk.bf16.mxu1 %vm278_vm3, %v803_v34 }
   0xe   :  { %733 = vmatpush3.bf16.msra.mxu0 %v800_v9 }
   0xf   :  { %794 = vmatprep.subr.msk.bf16.mxu0 %vm278_vm3, %v801_v10 }
  0x11   :  { %735 = vmatmul.mubr.msk.bf16.vlgmr.msra.gmra.mxu0 %vm81_vm2, %v44_v17 }
  0x12   :  { %738 = vmatprep.mubr.msk.bf16.mxu0 %vm81_vm2, %v45_v18  ;;  %751 = vmatpush3.bf16.msra.mxu0 %v280_v13 }
  0x13   :  { %752 = vmatprep.subr.bf16.mxu0 %v802_v14 }
  0x16   :  { %753 = vmatpush3.bf16.msra.mxu0 %v802_v14 }
  0x19   :  { %739 = vmatmul.mubr.msk.bf16.gmra.mxu0 %vm81_vm2, %v46_v23 }
  0x1a   :  { %742 = vmatprep.mubr.msk.bf16.mxu0 %vm81_vm2, %v47_v24 }
  0x21   :  { %743 = vmatmul.mubr.msk.bf16.gmra.mxu0 %vm81_vm2, %v48_v29  ;;  %v804_v29 = vld [vmem:[%s1038_s5] sm:$0xff]  }
  0x22   :  { %746 = vmatprep.mubr.msk.bf16.mxu0 %vm81_vm2, %v49_v30 }
  0x29   :  { %747 = vmatmul.mubr.msk.bf16.gmra.mxu0 %vm81_vm2, %v50_v33 }
  0xd1   :  { %v736_v35 = vpop.f32.mrf.mxu0 }
  0xd2   :  { %v156_v41 = vadd.f32 %v736_v35, %v631_v37 }
  0xd3   :  { %v147_v36 = vpop.f32.mrf.mxu0 }
  0xd4   :  { %v148_v39 = vadd.f32 %v631_v37, %v147_v36  ;;  %v212_v48 = vmax.f32 %v156_v41, 0.0 }
  0xd5   :  { %v737_v38 = vpop.f32.mrf.mxu0 }
  0xd6   :  { %v159_v40 = vadd.f32 %v737_v38, %v631_v37  ;;  %v210_v46 = vmax.f32 %v148_v39, 0.0 }
  0xd7   :  { %v150_v42 = vpop.f32.mrf.mxu0 }
  0xd8   :  { %v151_v43 = vadd.f32 %v631_v37, %v150_v42  ;;  %v213_v44 = vmax.f32 %v159_v40, 0.0 }
  0xd9   :  { %v740_v45 = vpop.f32.mrf.mxu0 }
  0xda   :  { %v211_v47 = vmax.f32 %v151_v43, 0.0  ;;  %v227_v51 = vpack.c.bf16 %v213_v44, %v212_v48  ;;  %v172_v55 = vadd.f32 %v740_v45, %v631_v37 }
  0xdb   :  { %v163_v49 = vpop.f32.mrf.mxu0 }
  0xdc   :  { %v226_v50 = vpack.c.bf16 %v211_v47, %v210_v46  ;;  %v164_v53 = vadd.f32 %v631_v37, %v163_v49  ;;  %v216_v62 = vmax.f32 %v172_v55, 0.0 }
  0xdd   :  { %v741_v52 = vpop.f32.mrf.mxu0 }
  0xde   :  { %v175_v54 = vadd.f32 %v741_v52, %v631_v37  ;;  %754 = vmatprep.mubr.msk.bf16.mxu0 %vm253_vm4, %v226_v50  ;;  %v214_v60 = vmax.f32 %v164_v53, 0.0 }
  0xdf   :  { %v166_v56 = vpop.f32.mrf.mxu0  ;;  %755 = vmatmul.mubr.msk.bf16.vlgmr.msra.gmra.mxu0 %vm253_vm4, %v227_v51 }
  0xe0   :  { %v167_v57 = vadd.f32 %v631_v37, %v166_v56  ;;  %v217_v58 = vmax.f32 %v175_v54, 0.0 }
  0xe1   :  { %v744_v59 = vpop.f32.mrf.mxu0 }
  0xe2   :  { %v215_v61 = vmax.f32 %v167_v57, 0.0  ;;  %v229_v1 = vpack.c.bf16 %v217_v58, %v216_v62  ;;  %v188_v6 = vadd.f32 %v744_v59, %v631_v37 }
  0xe3   :  { %v179_v63 = vpop.f32.mrf.mxu0 }
  0xe4   :  { %v228_v0 = vpack.c.bf16 %v215_v61, %v214_v60  ;;  %v180_v4 = vadd.f32 %v631_v37, %v179_v63  ;;  %v220_v13 = vmax.f32 %v188_v6, 0.0 }
  0xe5   :  { %v745_v2 = vpop.f32.mrf.mxu0 }
  0xe6   :  { %v191_v5 = vadd.f32 %v745_v2, %v631_v37  ;;  %758 = vmatprep.mubr.msk.bf16.mxu1 %vm253_vm4, %v228_v0  ;;  %v218_v11 = vmax.f32 %v180_v4, 0.0 }
  0xe7   :  { %v182_v7 = vpop.f32.mrf.mxu0  ;;  %759 = vmatmul.mubr.msk.bf16.vlgmr.msra.gmra.mxu1 %vm253_vm4, %v229_v1 }
  0xe8   :  { %v183_v8 = vadd.f32 %v631_v37, %v182_v7  ;;  %771 = vmatpush3.bf16.msra.mxu1 %v447_v3  ;;  %v221_v9 = vmax.f32 %v191_v5, 0.0 }
  0xe9   :  { %v748_v10 = vpop.f32.mrf.mxu0  ;;  %772 = vmatprep.subr.bf16.mxu1 %v804_v29 }
  0xea   :  { %v219_v12 = vmax.f32 %v183_v8, 0.0  ;;  %v231_v16 = vpack.c.bf16 %v221_v9, %v220_v13  ;;  %v204_v20 = vadd.f32 %v748_v10, %v631_v37 }
  0xeb   :  { %v195_v14 = vpop.f32.mrf.mxu0 }
  0xec   :  { %v230_v15 = vpack.c.bf16 %v219_v12, %v218_v11  ;;  %v196_v18 = vadd.f32 %v631_v37, %v195_v14  ;;  %v224_v26 = vmax.f32 %v204_v20, 0.0  ;;  %773 = vmatpush3.bf16.msra.mxu1 %v804_v29 }
  0xed   :  { %v749_v17 = vpop.f32.mrf.mxu0 }
  0xee   :  { %v207_v19 = vadd.f32 %v749_v17, %v631_v37  ;;  %762 = vmatprep.mubr.msk.bf16.mxu1 %vm253_vm4, %v230_v15  ;;  %v222_v24 = vmax.f32 %v196_v18, 0.0 }
  0xef   :  { %v198_v21 = vpop.f32.mrf.mxu0  ;;  %763 = vmatmul.mubr.msk.bf16.gmra.mxu1 %vm253_vm4, %v231_v16 }
  0xf0   :  { %v199_v22 = vadd.f32 %v631_v37, %v198_v21  ;;  %v225_v23 = vmax.f32 %v207_v19, 0.0 }
  0xf2   :  { %v223_v25 = vmax.f32 %v199_v22, 0.0  ;;  %v233_v28 = vpack.c.bf16 %v225_v23, %v224_v26  ;;  %v953_v23 = vld [vmem:[%s1041_s6] ss:$0 sm:$0xff] }
  0xf4   :  { %v232_v27 = vpack.c.bf16 %v223_v25, %v222_v24 }
  0xf6   :  { %766 = vmatprep.mubr.msk.bf16.mxu1 %vm253_vm4, %v232_v27 }
  0xf7   :  { %767 = vmatmul.mubr.msk.bf16.gmra.mxu1 %vm253_vm4, %v233_v28 }
 0x19f   :  { %v756_v30 = vpop.f32.mrf.mxu0 }
 0x1a0   :  { %v325_v36 = vadd.f32 %v756_v30, %v643_v32 }
 0x1a1   :  { %v316_v31 = vpop.f32.mrf.mxu0 }
 0x1a2   :  { %v317_v34 = vadd.f32 %v643_v32, %v316_v31  ;;  %v381_v43 = vmax.f32 %v325_v36, 0.0 }
 0x1a3   :  { %v757_v33 = vpop.f32.mrf.mxu0 }
 0x1a4   :  { %v328_v35 = vadd.f32 %v757_v33, %v643_v32  ;;  %v379_v41 = vmax.f32 %v317_v34, 0.0 }
 0x1a5   :  { %v319_v37 = vpop.f32.mrf.mxu0 }
 0x1a6   :  { %v320_v38 = vadd.f32 %v643_v32, %v319_v37  ;;  %v382_v39 = vmax.f32 %v328_v35, 0.0 }
 0x1a7   :  { %v760_v40 = vpop.f32.mrf.mxu1 }
 0x1a8   :  { %v380_v42 = vmax.f32 %v320_v38, 0.0  ;;  %v396_v46 = vpack.c.bf16 %v382_v39, %v381_v43  ;;  %v341_v50 = vadd.f32 %v760_v40, %v643_v32 }
 0x1a9   :  { %v332_v44 = vpop.f32.mrf.mxu1 }
 0x1aa   :  { %v395_v45 = vpack.c.bf16 %v380_v42, %v379_v41  ;;  %v333_v48 = vadd.f32 %v643_v32, %v332_v44  ;;  %v385_v57 = vmax.f32 %v341_v50, 0.0 }
 0x1ab   :  { %v761_v47 = vpop.f32.mrf.mxu1 }
 0x1ac   :  { %v344_v49 = vadd.f32 %v761_v47, %v643_v32  ;;  %774 = vmatprep.mubr.msk.bf16.mxu1 %vm253_vm4, %v395_v45  ;;  %v383_v55 = vmax.f32 %v333_v48, 0.0 }
 0x1ad   :  { %v335_v51 = vpop.f32.mrf.mxu1  ;;  %775 = vmatmul.mubr.msk.bf16.vlgmr.msra.gmra.mxu1 %vm253_vm4, %v396_v46 }
 0x1ae   :  { %v336_v52 = vadd.f32 %v643_v32, %v335_v51  ;;  %v386_v53 = vmax.f32 %v344_v49, 0.0 }
 0x1af   :  { %v764_v54 = vpop.f32.mrf.mxu1 }
 0x1b0   :  { %v384_v56 = vmax.f32 %v336_v52, 0.0  ;;  %v398_v60 = vpack.c.bf16 %v386_v53, %v385_v57  ;;  %v357_v0 = vadd.f32 %v764_v54, %v643_v32 }
 0x1b1   :  { %v348_v58 = vpop.f32.mrf.mxu1 }
 0x1b2   :  { %v397_v59 = vpack.c.bf16 %v384_v56, %v383_v55  ;;  %v349_v62 = vadd.f32 %v643_v32, %v348_v58  ;;  %v389_v7 = vmax.f32 %v357_v0, 0.0 }
 0x1b3   :  { %v765_v61 = vpop.f32.mrf.mxu1 }
 0x1b4   :  { %v360_v63 = vadd.f32 %v765_v61, %v643_v32  ;;  %778 = vmatprep.mubr.msk.bf16.mxu1 %vm253_vm4, %v397_v59  ;;  %v387_v5 = vmax.f32 %v349_v62, 0.0 }
 0x1b5   :  { %v351_v1 = vpop.f32.mrf.mxu1  ;;  %779 = vmatmul.mubr.msk.bf16.gmra.mxu1 %vm253_vm4, %v398_v60 }
 0x1b6   :  { %v352_v2 = vadd.f32 %v643_v32, %v351_v1  ;;  %v390_v3 = vmax.f32 %v360_v63, 0.0 }
 0x1b7   :  { %v768_v4 = vpop.f32.mrf.mxu1 }
 0x1b8   :  { %v388_v6 = vmax.f32 %v352_v2, 0.0  ;;  %v400_v10 = vpack.c.bf16 %v390_v3, %v389_v7  ;;  %v373_v14 = vadd.f32 %v768_v4, %v643_v32 }
 0x1b9   :  { %v364_v8 = vpop.f32.mrf.mxu1 }
 0x1ba   :  { %v399_v9 = vpack.c.bf16 %v388_v6, %v387_v5  ;;  %v365_v12 = vadd.f32 %v643_v32, %v364_v8  ;;  %v393_v20 = vmax.f32 %v373_v14, 0.0 }
 0x1bb   :  { %v769_v11 = vpop.f32.mrf.mxu1 }
 0x1bc   :  { %v376_v13 = vadd.f32 %v769_v11, %v643_v32  ;;  %782 = vmatprep.mubr.msk.bf16.mxu1 %vm253_vm4, %v399_v9  ;;  %v391_v18 = vmax.f32 %v365_v12, 0.0 }
 0x1bd   :  { %v367_v15 = vpop.f32.mrf.mxu1  ;;  %783 = vmatmul.mubr.msk.bf16.gmra.mxu1 %vm253_vm4, %v400_v10 }
 0x1be   :  { %v368_v16 = vadd.f32 %v643_v32, %v367_v15  ;;  %v394_v17 = vmax.f32 %v376_v13, 0.0 }
 0x1c0   :  { %v392_v19 = vmax.f32 %v368_v16, 0.0  ;;  %v402_v22 = vpack.c.bf16 %v394_v17, %v393_v20 }
 0x1c2   :  { %v401_v21 = vpack.c.bf16 %v392_v19, %v391_v18 }
 0x1c4   :  { %786 = vmatprep.mubr.msk.bf16.mxu1 %vm253_vm4, %v401_v21 }
 0x1c5   :  { %787 = vmatmul.mubr.msk.bf16.gmra.mxu1 %vm253_vm4, %v402_v22 }
 0x26d   :  { %v776_v24 = vpop.f32.mrf.mxu1 }
 0x26e   :  { %v492_v25 = vadd.f32 %v776_v24, %v953_v23 }
 0x26f   :  { %v483_v26 = vpop.f32.mrf.mxu1 }
 0x270   :  { %v683_v27 = vpack.c.bf16 %v492_v25, %v492_v25  ;;  %v484_v28 = vadd.f32 %v953_v23, %v483_v26 }
 0x271   :  { %v777_v29 = vpop.f32.mrf.mxu1 }
 0x272   :  { %613 = vst.msk [vmem:[%s1042_s7 + $0x8] sm:$0xf] %vm610_vm5, %v683_v27  ;;  %v681_v30 = vpack.c.bf16 %v484_v28, %v484_v28  ;;  %v495_v31 = vadd.f32 %v777_v29, %v953_v23 }
 0x273   :  { %v486_v32 = vpop.f32.mrf.mxu1 }
 0x274   :  { %611 = vst.msk [vmem:[%s1042_s7] sm:$0xf] %vm610_vm5, %v681_v30  ;;  %v684_v33 = vpack.c.bf16 %v495_v31, %v495_v31  ;;  %v487_v34 = vadd.f32 %v953_v23, %v486_v32 }
 0x275   :  { %v780_v35 = vpop.f32.mrf.mxu1 }
 0x276   :  { %614 = vst.msk [vmem:[%s1042_s7 + $0xc] sm:$0xf] %vm610_vm5, %v684_v33  ;;  %v682_v36 = vpack.c.bf16 %v487_v34, %v487_v34  ;;  %v508_v37 = vadd.f32 %v780_v35, %v953_v23 }
 0x277   :  { %v499_v38 = vpop.f32.mrf.mxu1 }
 0x278   :  { %612 = vst.msk [vmem:[%s1042_s7 + $0x4] sm:$0xf] %vm610_vm5, %v682_v36  ;;  %v687_v39 = vpack.c.bf16 %v508_v37, %v508_v37  ;;  %v500_v40 = vadd.f32 %v953_v23, %v499_v38 }
 0x279   :  { %v781_v41 = vpop.f32.mrf.mxu1 }
 0x27a   :  { %617 = vst.msk [vmem:[%s1042_s7 + $0x18] sm:$0xf] %vm610_vm5, %v687_v39  ;;  %v685_v42 = vpack.c.bf16 %v500_v40, %v500_v40  ;;  %v511_v43 = vadd.f32 %v781_v41, %v953_v23 }
 0x27b   :  { %v502_v44 = vpop.f32.mrf.mxu1 }
 0x27c   :  { %615 = vst.msk [vmem:[%s1042_s7 + $0x10] sm:$0xf] %vm610_vm5, %v685_v42  ;;  %v688_v45 = vpack.c.bf16 %v511_v43, %v511_v43  ;;  %v503_v46 = vadd.f32 %v953_v23, %v502_v44 }
 0x27d   :  { %v784_v47 = vpop.f32.mrf.mxu1 }
 0x27e   :  { %618 = vst.msk [vmem:[%s1042_s7 + $0x1c] sm:$0xf] %vm610_vm5, %v688_v45  ;;  %v686_v48 = vpack.c.bf16 %v503_v46, %v503_v46  ;;  %v524_v49 = vadd.f32 %v784_v47, %v953_v23 }
 0x27f   :  { %v515_v50 = vpop.f32.mrf.mxu1 }
 0x280   :  { %616 = vst.msk [vmem:[%s1042_s7 + $0x14] sm:$0xf] %vm610_vm5, %v686_v48  ;;  %v691_v51 = vpack.c.bf16 %v524_v49, %v524_v49  ;;  %v516_v52 = vadd.f32 %v953_v23, %v515_v50 }
 0x281   :  { %v785_v53 = vpop.f32.mrf.mxu1 }
 0x282   :  { %621 = vst.msk [vmem:[%s1042_s7 + $0x28] sm:$0xf] %vm610_vm5, %v691_v51  ;;  %v689_v54 = vpack.c.bf16 %v516_v52, %v516_v52  ;;  %v527_v55 = vadd.f32 %v785_v53, %v953_v23 }
 0x283   :  { %v518_v56 = vpop.f32.mrf.mxu1 }
 0x284   :  { %619 = vst.msk [vmem:[%s1042_s7 + $0x20] sm:$0xf] %vm610_vm5, %v689_v54  ;;  %v692_v57 = vpack.c.bf16 %v527_v55, %v527_v55  ;;  %v519_v58 = vadd.f32 %v953_v23, %v518_v56 }
 0x285   :  { %v788_v59 = vpop.f32.mrf.mxu1 }
 0x286   :  { %622 = vst.msk [vmem:[%s1042_s7 + $0x2c] sm:$0xf] %vm610_vm5, %v692_v57  ;;  %v690_v60 = vpack.c.bf16 %v519_v58, %v519_v58  ;;  %v540_v61 = vadd.f32 %v788_v59, %v953_v23 }
 0x287   :  { %v531_v62 = vpop.f32.mrf.mxu1 }
 0x288   :  { %620 = vst.msk [vmem:[%s1042_s7 + $0x24] sm:$0xf] %vm610_vm5, %v690_v60  ;;  %v695_v63 = vpack.c.bf16 %v540_v61, %v540_v61  ;;  %v532_v0 = vadd.f32 %v953_v23, %v531_v62 }
 0x289   :  { %v789_v1 = vpop.f32.mrf.mxu1 }
 0x28a   :  { %625 = vst.msk [vmem:[%s1042_s7 + $0x38] sm:$0xf] %vm610_vm5, %v695_v63  ;;  %v693_v2 = vpack.c.bf16 %v532_v0, %v532_v0  ;;  %v543_v3 = vadd.f32 %v789_v1, %v953_v23 }
 0x28b   :  { %v534_v4 = vpop.f32.mrf.mxu1 }
 0x28c   :  { %623 = vst.msk [vmem:[%s1042_s7 + $0x30] sm:$0xf] %vm610_vm5, %v693_v2  ;;  %v696_v5 = vpack.c.bf16 %v543_v3, %v543_v3  ;;  %v535_v6 = vadd.f32 %v953_v23, %v534_v4 }
 0x28e   :  { %626 = vst.msk [vmem:[%s1042_s7 + $0x3c] sm:$0xf] %vm610_vm5, %v696_v5  ;;  %v694_v7 = vpack.c.bf16 %v535_v6, %v535_v6 }
 0x290   :  { %624 = vst.msk [vmem:[%s1042_s7 + $0x34] sm:$0xf] %vm610_vm5, %v694_v7 }

</bundles_post_ra>
